<compile_context>
chip_gen: v6e
topology: v6e:2x2x1
jax: 0.10.0
libtpu: 0.0.40
codegen_flags: <defaults>
</compile_context>

<pallas_src>
import functools

import jax
import jax.numpy as jnp
from jax.experimental import pallas as pl
from jax.experimental.pallas import tpu as pltpu


def _resblock_kernel(K, H, W, rs_ref, x_ref, w1_ref, b1_ref, w2_ref, b2_ref,
                     o_ref):
    """One batch element per grid step.

    All activations are (C, H*W): channels on sublanes, flattened spatial on
    lanes (lane-dense).

    rs_ref : (1,) f32 in SMEM               res_scale
    x_ref  : (1, C, H*W)                    input (NCHW, spatial flattened)
    w*_ref : (K*K, Cout, Cin)               per-tap conv weights (mm dtype)
    b*_ref : (C, 1) f32                     biases
    o_ref  : (1, C, H*W)                    output
    """
    _, C, HW = o_ref.shape
    pad = K // 2
    mm = w1_ref.dtype                       # MXU operand dtype (f32 or bf16)

    x = x_ref[0]                            # (C, HW), input dtype
    x_mm = x.astype(mm)

    # Column index of every lane position (hoisted; reused by all taps).
    w_idx = jax.lax.broadcasted_iota(jnp.int32, (1, HW), 1) % W

    def tap_windows(src):
        """Yield (tap, zero-padded shifted window src[:, h+dh, w+dw])."""
        zero = jnp.zeros((), src.dtype)
        for kh in range(K):
            for kw in range(K):
                dh, dw = kh - pad, kw - pad
                s = dh * W + dw
                # Static lane shift with zero extension; the zero fill also
                # covers rows that fall outside the image (h+dh out of range).
                if s > 0:
                    v = jnp.concatenate(
                        [src[:, s:], jnp.zeros((src.shape[0], s), src.dtype)],
                        axis=1)
                elif s < 0:
                    v = jnp.concatenate(
                        [jnp.zeros((src.shape[0], -s), src.dtype),
                         src[:, :HW + s]], axis=1)
                else:
                    v = src
                # Columns that wrapped across a row boundary (w+dw out of
                # range) are zeroed with a cheap VPU select.
                if dw > 0:
                    v = jnp.where(w_idx < W - dw, v, zero)
                elif dw < 0:
                    v = jnp.where(w_idx >= -dw, v, zero)
                yield kh * K + kw, v

    # ---- conv1: K*K accumulated (Cout,Cin) x (Cin,HW) matmuls, f32 acc -----
    acc = jnp.zeros((C, HW), jnp.float32)
    for t, v in tap_windows(x_mm):
        acc += jnp.dot(w1_ref[t], v, preferred_element_type=jnp.float32)
    y1 = jnp.maximum(acc + b1_ref[...], 0.0).astype(mm)     # bias + ReLU, f32

    # ---- conv2 --------------------------------------------------------------
    acc = jnp.zeros((C, HW), jnp.float32)
    for t, v in tap_windows(y1):
        acc += jnp.dot(w2_ref[t], v, preferred_element_type=jnp.float32)
    res = (acc + b2_ref[...]) * rs_ref[0]

    # Residual add in fp32, single cast at the very end.
    o_ref[0] = (res + x.astype(jnp.float32)).astype(o_ref.dtype)


def resblock_pallas(x_nchw, w1, b1, w2, b2, res_scale=1.0, matmul_dtype=None):
    """ResBlock forward.

    x_nchw : (B, C, H, W).   w1/w2 : (K, K, Cin, Cout) HWIO.   b1/b2 : (C,).
    matmul_dtype : optional MXU operand dtype (e.g. jnp.bfloat16); accumulation,
                   bias, ReLU, scaling and the residual add stay in float32.
    """
    B, C, H, W = x_nchw.shape
    K = w1.shape[0]
    HW = H * W
    mm = jnp.float32 if matmul_dtype is None else matmul_dtype

    # Free bitcast reshape: merge the minor spatial dims -> lane-dense layout.
    x_flat = x_nchw.reshape(B, C, HW)

    # HWIO (K,K,Cin,Cout) -> per-tap (Cout,Cin): (K*K, Cout, Cin).  Tiny
    # one-off host-side transform on the weights.
    w1_t = jnp.transpose(w1, (0, 1, 3, 2)).reshape(K * K, C, C).astype(mm)
    w2_t = jnp.transpose(w2, (0, 1, 3, 2)).reshape(K * K, C, C).astype(mm)
    b1_2d = b1.reshape(C, 1).astype(jnp.float32)
    b2_2d = b2.reshape(C, 1).astype(jnp.float32)
    rs = jnp.asarray([res_scale], dtype=jnp.float32)       # SMEM scalar

    kernel = functools.partial(_resblock_kernel, K, H, W)

    out_flat = pl.pallas_call(
        kernel,
        out_shape=jax.ShapeDtypeStruct((B, C, HW), x_nchw.dtype),
        grid_spec=pltpu.PrefetchScalarGridSpec(
            num_scalar_prefetch=0,
            grid=(B,),
            in_specs=[
                pl.BlockSpec(memory_space=pltpu.MemorySpace.SMEM),  # res_scale
                pl.BlockSpec((1, C, HW), lambda b: (b, 0, 0)),      # x
                pl.BlockSpec((K * K, C, C), lambda b: (0, 0, 0)),   # w1
                pl.BlockSpec((C, 1), lambda b: (0, 0)),             # b1
                pl.BlockSpec((K * K, C, C), lambda b: (0, 0, 0)),   # w2
                pl.BlockSpec((C, 1), lambda b: (0, 0)),             # b2
            ],
            out_specs=pl.BlockSpec((1, C, HW), lambda b: (b, 0, 0)),
        ),
        compiler_params=pltpu.CompilerParams(
            dimension_semantics=("parallel",)),
    )(rs, x_flat, w1_t, b1_2d, w2_t, b2_2d)

    # Free bitcast reshape back to NCHW.
    return out_flat.reshape(B, C, H, W)


def resblock_reference(x_nchw, w1, b1, w2, b2, res_scale=1.0):
    """Plain-JAX reference (NCHW activations, HWIO weights)."""
    dn = jax.lax.conv_dimension_numbers(x_nchw.shape, w1.shape,
                                        ("NCHW", "HWIO", "NCHW"))
    pad = w1.shape[0] // 2
    y = jax.lax.conv_general_dilated(x_nchw, w1, (1, 1),
                                     [(pad, pad), (pad, pad)],
                                     dimension_numbers=dn)
    y = y + b1[None, :, None, None]
    y = jnp.maximum(y, 0.0)
    y = jax.lax.conv_general_dilated(y, w2, (1, 1),
                                     [(pad, pad), (pad, pad)],
                                     dimension_numbers=dn)
    y = y + b2[None, :, None, None]
    return y * res_scale + x_nchw


if __name__ == "__main__":
    # Small deterministic problem: B=2, n_feats=4, 16x16 spatial, 3x3 conv.
    B, C, H, W, K = 2, 4, 16, 16, 3
    res_scale = 0.5

    key = jax.random.PRNGKey(0)
    kx, kw1, kb1, kw2, kb2 = jax.random.split(key, 5)
    x = jax.random.normal(kx, (B, C, H, W), dtype=jnp.float32)
    # Synthetic Conv2d(n_feats, n_feats, 3, bias=True) parameters in HWIO.
    w1 = jax.random.normal(kw1, (K, K, C, C), dtype=jnp.float32) * 0.1
    b1 = jax.random.normal(kb1, (C,), dtype=jnp.float32) * 0.1
    w2 = jax.random.normal(kw2, (K, K, C, C), dtype=jnp.float32) * 0.1
    b2 = jax.random.normal(kb2, (C,), dtype=jnp.float32) * 0.1

    ref = jax.block_until_ready(
        resblock_reference(x, w1, b1, w2, b2, res_scale))

    # fp32 MXU operands: tight match against the reference.
    out = jax.block_until_ready(
        resblock_pallas(x, w1, b1, w2, b2, res_scale))
    assert out.shape == (B, C, H, W)
    assert jnp.allclose(out, ref, atol=1e-4, rtol=1e-4), \
        float(jnp.max(jnp.abs(out - ref)))

    # bf16 MXU operands (fast path), fp32 accumulate / elementwise.
    out_bf16 = jax.block_until_ready(
        resblock_pallas(x, w1, b1, w2, b2, res_scale,
                        matmul_dtype=jnp.bfloat16))
    assert jnp.allclose(out_bf16, ref, atol=5e-2, rtol=5e-2), \
        float(jnp.max(jnp.abs(out_bf16 - ref)))

    print("KERNEL_OK")
</pallas_src>

<mosaic_0001>
module attributes {stable_mosaic.version = 11 : i64} {
  func.func @_resblock_kernel(%arg0: i32, %arg1: memref<1xf32, #tpu.memory_space<smem>>, %arg2: memref<1x4x256xf32, #tpu.memory_space<vmem>>, %arg3: memref<9x4x4xf32, #tpu.memory_space<vmem>>, %arg4: memref<4x1xf32, #tpu.memory_space<vmem>>, %arg5: memref<9x4x4xf32, #tpu.memory_space<vmem>>, %arg6: memref<4x1xf32, #tpu.memory_space<vmem>>, %arg7: memref<1x4x256xf32, #tpu.memory_space<vmem>>) attributes {dimension_semantics = [#tpu.dimension_semantics<parallel>], iteration_bounds = array<i64: 2>, scalar_prefetch = 0 : i64, scratch_operands = 0 : i64, tpu.core_type = #tpu.core_type<tc>, window_params = [{transform_indices = @transform_0, window_bounds = array<i64: 1>}, {transform_indices = @transform_1, window_bounds = array<i64: 1, 4, 256>}, {pipeline_mode = #tpu.pipeline_mode<synchronous>, transform_indices = @transform_2, window_bounds = array<i64: 9, 4, 4>}, {pipeline_mode = #tpu.pipeline_mode<synchronous>, transform_indices = @transform_3, window_bounds = array<i64: 4, 1>}, {pipeline_mode = #tpu.pipeline_mode<synchronous>, transform_indices = @transform_4, window_bounds = array<i64: 9, 4, 4>}, {pipeline_mode = #tpu.pipeline_mode<synchronous>, transform_indices = @transform_5, window_bounds = array<i64: 4, 1>}, {transform_indices = @transform_6, window_bounds = array<i64: 1, 4, 256>}]} {
    %c0 = arith.constant 0 : index
    %c0_0 = arith.constant 0 : index
    %c0_1 = arith.constant 0 : index
    %0 = vector.load %arg2[%c0, %c0_0, %c0_1] : memref<1x4x256xf32, #tpu.memory_space<vmem>>, vector<1x4x256xf32>
    %1 = vector.shape_cast %0 : vector<1x4x256xf32> to vector<4x256xf32>
    %2 = tpu.iota {dimensions = array<i32: 1>} : vector<1x256xi32>
    %c16_i32 = arith.constant 16 : i32
    %c0_i32 = arith.constant 0 : i32
    %3 = arith.cmpi eq, %c16_i32, %c0_i32 : i32
    %c1_i32 = arith.constant 1 : i32
    %4 = arith.select %3, %c1_i32, %c16_i32 : i32
    %5 = vector.broadcast %4 : i32 to vector<1x256xi32>
    %6 = arith.remsi %2, %5 : vector<1x256xi32>
    %c0_i32_2 = arith.constant 0 : i32
    %7 = vector.broadcast %c0_i32_2 : i32 to vector<1x256xi32>
    %8 = arith.cmpi ne, %6, %7 : vector<1x256xi32>
    %c0_i32_3 = arith.constant 0 : i32
    %9 = vector.broadcast %c0_i32_3 : i32 to vector<1x256xi32>
    %10 = arith.cmpi slt, %6, %9 : vector<1x256xi32>
    %c0_i32_4 = arith.constant 0 : i32
    %11 = arith.cmpi slt, %4, %c0_i32_4 : i32
    %12 = vector.broadcast %11 : i1 to vector<1x256xi1>
    %13 = vector.broadcast %12 : vector<1x256xi1> to vector<1x256xi1>
    %14 = arith.xori %10, %13 : vector<1x256xi1>
    %15 = arith.andi %14, %8 : vector<1x256xi1>
    %16 = vector.broadcast %4 : i32 to vector<1x256xi32>
    %17 = arith.addi %6, %16 : vector<1x256xi32>
    %18 = arith.select %15, %17, %6 : vector<1x256xi1>, vector<1x256xi32>
    %cst = arith.constant 0.000000e+00 : f32
    %19 = vector.broadcast %cst : f32 to vector<4x256xf32>
    %cst_5 = arith.constant 0.000000e+00 : f32
    %20 = vector.broadcast %cst_5 : f32 to vector<4x17xf32>
    %21 = vector.extract_strided_slice %1 {offsets = [0, 0], sizes = [4, 239], strides = [1, 1]} : vector<4x256xf32> to vector<4x239xf32>
    %22 = tpu.concatenate %20, %21 in 1 : vector<4x17xf32>, vector<4x239xf32> -> vector<4x256xf32>
    %c1_i32_6 = arith.constant 1 : i32
    %23 = vector.broadcast %c1_i32_6 : i32 to vector<1x256xi32>
    %24 = arith.cmpi sge, %18, %23 : vector<1x256xi32>
    %cst_7 = arith.constant 0.000000e+00 : f32
    %25 = vector.shape_cast %24 : vector<1x256xi1> to vector<1x256xi1>
    %26 = vector.broadcast %25 : vector<1x256xi1> to vector<4x256xi1>
    %27 = vector.broadcast %cst_7 : f32 to vector<4x256xf32>
    %28 = arith.select %26, %22, %27 : vector<4x256xi1>, vector<4x256xf32>
    %c0_8 = arith.constant 0 : index
    %c0_9 = arith.constant 0 : index
    %c0_10 = arith.constant 0 : index
    %29 = vector.load %arg3[%c0_8, %c0_9, %c0_10] : memref<9x4x4xf32, #tpu.memory_space<vmem>>, vector<1x4x4xf32>
    %30 = vector.shape_cast %29 : vector<1x4x4xf32> to vector<4x4xf32>
    %cst_11 = arith.constant dense<0.000000e+00> : vector<4x256xf32>
    %31 = tpu.matmul %30, %28, %cst_11 {dimension_numbers = #tpu.dot_dimension_numbers<[1], [0], [0], [1], [0, 0, 1, 1], [], []>} : vector<4x4xf32>, vector<4x256xf32>, vector<4x256xf32> -> vector<4x256xf32>
    %32 = arith.addf %19, %31 : vector<4x256xf32>
    %cst_12 = arith.constant 0.000000e+00 : f32
    %33 = vector.broadcast %cst_12 : f32 to vector<4x16xf32>
    %34 = vector.extract_strided_slice %1 {offsets = [0, 0], sizes = [4, 240], strides = [1, 1]} : vector<4x256xf32> to vector<4x240xf32>
    %35 = tpu.concatenate %33, %34 in 1 : vector<4x16xf32>, vector<4x240xf32> -> vector<4x256xf32>
    %c1 = arith.constant 1 : index
    %c0_13 = arith.constant 0 : index
    %c0_14 = arith.constant 0 : index
    %36 = vector.load %arg3[%c1, %c0_13, %c0_14] : memref<9x4x4xf32, #tpu.memory_space<vmem>>, vector<1x4x4xf32>
    %37 = vector.shape_cast %36 : vector<1x4x4xf32> to vector<4x4xf32>
    %cst_15 = arith.constant dense<0.000000e+00> : vector<4x256xf32>
    %38 = tpu.matmul %37, %35, %cst_15 {dimension_numbers = #tpu.dot_dimension_numbers<[1], [0], [0], [1], [0, 0, 1, 1], [], []>} : vector<4x4xf32>, vector<4x256xf32>, vector<4x256xf32> -> vector<4x256xf32>
    %39 = arith.addf %32, %38 : vector<4x256xf32>
    %cst_16 = arith.constant 0.000000e+00 : f32
    %40 = vector.broadcast %cst_16 : f32 to vector<4x15xf32>
    %41 = vector.extract_strided_slice %1 {offsets = [0, 0], sizes = [4, 241], strides = [1, 1]} : vector<4x256xf32> to vector<4x241xf32>
    %42 = tpu.concatenate %40, %41 in 1 : vector<4x15xf32>, vector<4x241xf32> -> vector<4x256xf32>
    %c15_i32 = arith.constant 15 : i32
    %43 = vector.broadcast %c15_i32 : i32 to vector<1x256xi32>
    %44 = arith.cmpi slt, %18, %43 : vector<1x256xi32>
    %cst_17 = arith.constant 0.000000e+00 : f32
    %45 = vector.shape_cast %44 : vector<1x256xi1> to vector<1x256xi1>
    %46 = vector.broadcast %45 : vector<1x256xi1> to vector<4x256xi1>
    %47 = vector.broadcast %cst_17 : f32 to vector<4x256xf32>
    %48 = arith.select %46, %42, %47 : vector<4x256xi1>, vector<4x256xf32>
    %c2 = arith.constant 2 : index
    %c0_18 = arith.constant 0 : index
    %c0_19 = arith.constant 0 : index
    %49 = vector.load %arg3[%c2, %c0_18, %c0_19] : memref<9x4x4xf32, #tpu.memory_space<vmem>>, vector<1x4x4xf32>
    %50 = vector.shape_cast %49 : vector<1x4x4xf32> to vector<4x4xf32>
    %cst_20 = arith.constant dense<0.000000e+00> : vector<4x256xf32>
    %51 = tpu.matmul %50, %48, %cst_20 {dimension_numbers = #tpu.dot_dimension_numbers<[1], [0], [0], [1], [0, 0, 1, 1], [], []>} : vector<4x4xf32>, vector<4x256xf32>, vector<4x256xf32> -> vector<4x256xf32>
    %52 = arith.addf %39, %51 : vector<4x256xf32>
    %cst_21 = arith.constant 0.000000e+00 : f32
    %53 = vector.broadcast %cst_21 : f32 to vector<4x1xf32>
    %54 = vector.extract_strided_slice %1 {offsets = [0, 0], sizes = [4, 255], strides = [1, 1]} : vector<4x256xf32> to vector<4x255xf32>
    %55 = tpu.concatenate %53, %54 in 1 : vector<4x1xf32>, vector<4x255xf32> -> vector<4x256xf32>
    %c1_i32_22 = arith.constant 1 : i32
    %56 = vector.broadcast %c1_i32_22 : i32 to vector<1x256xi32>
    %57 = arith.cmpi sge, %18, %56 : vector<1x256xi32>
    %cst_23 = arith.constant 0.000000e+00 : f32
    %58 = vector.shape_cast %57 : vector<1x256xi1> to vector<1x256xi1>
    %59 = vector.broadcast %58 : vector<1x256xi1> to vector<4x256xi1>
    %60 = vector.broadcast %cst_23 : f32 to vector<4x256xf32>
    %61 = arith.select %59, %55, %60 : vector<4x256xi1>, vector<4x256xf32>
    %c3 = arith.constant 3 : index
    %c0_24 = arith.constant 0 : index
    %c0_25 = arith.constant 0 : index
    %62 = vector.load %arg3[%c3, %c0_24, %c0_25] : memref<9x4x4xf32, #tpu.memory_space<vmem>>, vector<1x4x4xf32>
    %63 = vector.shape_cast %62 : vector<1x4x4xf32> to vector<4x4xf32>
    %cst_26 = arith.constant dense<0.000000e+00> : vector<4x256xf32>
    %64 = tpu.matmul %63, %61, %cst_26 {dimension_numbers = #tpu.dot_dimension_numbers<[1], [0], [0], [1], [0, 0, 1, 1], [], []>} : vector<4x4xf32>, vector<4x256xf32>, vector<4x256xf32> -> vector<4x256xf32>
    %65 = arith.addf %52, %64 : vector<4x256xf32>
    %c4 = arith.constant 4 : index
    %c0_27 = arith.constant 0 : index
    %c0_28 = arith.constant 0 : index
    %66 = vector.load %arg3[%c4, %c0_27, %c0_28] : memref<9x4x4xf32, #tpu.memory_space<vmem>>, vector<1x4x4xf32>
    %67 = vector.shape_cast %66 : vector<1x4x4xf32> to vector<4x4xf32>
    %cst_29 = arith.constant dense<0.000000e+00> : vector<4x256xf32>
    %68 = tpu.matmul %67, %1, %cst_29 {dimension_numbers = #tpu.dot_dimension_numbers<[1], [0], [0], [1], [0, 0, 1, 1], [], []>} : vector<4x4xf32>, vector<4x256xf32>, vector<4x256xf32> -> vector<4x256xf32>
    %69 = arith.addf %65, %68 : vector<4x256xf32>
    %70 = vector.extract_strided_slice %1 {offsets = [0, 1], sizes = [4, 255], strides = [1, 1]} : vector<4x256xf32> to vector<4x255xf32>
    %cst_30 = arith.constant 0.000000e+00 : f32
    %71 = vector.broadcast %cst_30 : f32 to vector<4x1xf32>
    %72 = tpu.concatenate %70, %71 in 1 : vector<4x255xf32>, vector<4x1xf32> -> vector<4x256xf32>
    %c15_i32_31 = arith.constant 15 : i32
    %73 = vector.broadcast %c15_i32_31 : i32 to vector<1x256xi32>
    %74 = arith.cmpi slt, %18, %73 : vector<1x256xi32>
    %cst_32 = arith.constant 0.000000e+00 : f32
    %75 = vector.shape_cast %74 : vector<1x256xi1> to vector<1x256xi1>
    %76 = vector.broadcast %75 : vector<1x256xi1> to vector<4x256xi1>
    %77 = vector.broadcast %cst_32 : f32 to vector<4x256xf32>
    %78 = arith.select %76, %72, %77 : vector<4x256xi1>, vector<4x256xf32>
    %c5 = arith.constant 5 : index
    %c0_33 = arith.constant 0 : index
    %c0_34 = arith.constant 0 : index
    %79 = vector.load %arg3[%c5, %c0_33, %c0_34] : memref<9x4x4xf32, #tpu.memory_space<vmem>>, vector<1x4x4xf32>
    %80 = vector.shape_cast %79 : vector<1x4x4xf32> to vector<4x4xf32>
    %cst_35 = arith.constant dense<0.000000e+00> : vector<4x256xf32>
    %81 = tpu.matmul %80, %78, %cst_35 {dimension_numbers = #tpu.dot_dimension_numbers<[1], [0], [0], [1], [0, 0, 1, 1], [], []>} : vector<4x4xf32>, vector<4x256xf32>, vector<4x256xf32> -> vector<4x256xf32>
    %82 = arith.addf %69, %81 : vector<4x256xf32>
    %83 = vector.extract_strided_slice %1 {offsets = [0, 15], sizes = [4, 241], strides = [1, 1]} : vector<4x256xf32> to vector<4x241xf32>
    %cst_36 = arith.constant 0.000000e+00 : f32
    %84 = vector.broadcast %cst_36 : f32 to vector<4x15xf32>
    %85 = tpu.concatenate %83, %84 in 1 : vector<4x241xf32>, vector<4x15xf32> -> vector<4x256xf32>
    %c1_i32_37 = arith.constant 1 : i32
    %86 = vector.broadcast %c1_i32_37 : i32 to vector<1x256xi32>
    %87 = arith.cmpi sge, %18, %86 : vector<1x256xi32>
    %cst_38 = arith.constant 0.000000e+00 : f32
    %88 = vector.shape_cast %87 : vector<1x256xi1> to vector<1x256xi1>
    %89 = vector.broadcast %88 : vector<1x256xi1> to vector<4x256xi1>
    %90 = vector.broadcast %cst_38 : f32 to vector<4x256xf32>
    %91 = arith.select %89, %85, %90 : vector<4x256xi1>, vector<4x256xf32>
    %c6 = arith.constant 6 : index
    %c0_39 = arith.constant 0 : index
    %c0_40 = arith.constant 0 : index
    %92 = vector.load %arg3[%c6, %c0_39, %c0_40] : memref<9x4x4xf32, #tpu.memory_space<vmem>>, vector<1x4x4xf32>
    %93 = vector.shape_cast %92 : vector<1x4x4xf32> to vector<4x4xf32>
    %cst_41 = arith.constant dense<0.000000e+00> : vector<4x256xf32>
    %94 = tpu.matmul %93, %91, %cst_41 {dimension_numbers = #tpu.dot_dimension_numbers<[1], [0], [0], [1], [0, 0, 1, 1], [], []>} : vector<4x4xf32>, vector<4x256xf32>, vector<4x256xf32> -> vector<4x256xf32>
    %95 = arith.addf %82, %94 : vector<4x256xf32>
    %96 = vector.extract_strided_slice %1 {offsets = [0, 16], sizes = [4, 240], strides = [1, 1]} : vector<4x256xf32> to vector<4x240xf32>
    %cst_42 = arith.constant 0.000000e+00 : f32
    %97 = vector.broadcast %cst_42 : f32 to vector<4x16xf32>
    %98 = tpu.concatenate %96, %97 in 1 : vector<4x240xf32>, vector<4x16xf32> -> vector<4x256xf32>
    %c7 = arith.constant 7 : index
    %c0_43 = arith.constant 0 : index
    %c0_44 = arith.constant 0 : index
    %99 = vector.load %arg3[%c7, %c0_43, %c0_44] : memref<9x4x4xf32, #tpu.memory_space<vmem>>, vector<1x4x4xf32>
    %100 = vector.shape_cast %99 : vector<1x4x4xf32> to vector<4x4xf32>
    %cst_45 = arith.constant dense<0.000000e+00> : vector<4x256xf32>
    %101 = tpu.matmul %100, %98, %cst_45 {dimension_numbers = #tpu.dot_dimension_numbers<[1], [0], [0], [1], [0, 0, 1, 1], [], []>} : vector<4x4xf32>, vector<4x256xf32>, vector<4x256xf32> -> vector<4x256xf32>
    %102 = arith.addf %95, %101 : vector<4x256xf32>
    %103 = vector.extract_strided_slice %1 {offsets = [0, 17], sizes = [4, 239], strides = [1, 1]} : vector<4x256xf32> to vector<4x239xf32>
    %cst_46 = arith.constant 0.000000e+00 : f32
    %104 = vector.broadcast %cst_46 : f32 to vector<4x17xf32>
    %105 = tpu.concatenate %103, %104 in 1 : vector<4x239xf32>, vector<4x17xf32> -> vector<4x256xf32>
    %c15_i32_47 = arith.constant 15 : i32
    %106 = vector.broadcast %c15_i32_47 : i32 to vector<1x256xi32>
    %107 = arith.cmpi slt, %18, %106 : vector<1x256xi32>
    %cst_48 = arith.constant 0.000000e+00 : f32
    %108 = vector.shape_cast %107 : vector<1x256xi1> to vector<1x256xi1>
    %109 = vector.broadcast %108 : vector<1x256xi1> to vector<4x256xi1>
    %110 = vector.broadcast %cst_48 : f32 to vector<4x256xf32>
    %111 = arith.select %109, %105, %110 : vector<4x256xi1>, vector<4x256xf32>
    %c8 = arith.constant 8 : index
    %c0_49 = arith.constant 0 : index
    %c0_50 = arith.constant 0 : index
    %112 = vector.load %arg3[%c8, %c0_49, %c0_50] : memref<9x4x4xf32, #tpu.memory_space<vmem>>, vector<1x4x4xf32>
    %113 = vector.shape_cast %112 : vector<1x4x4xf32> to vector<4x4xf32>
    %cst_51 = arith.constant dense<0.000000e+00> : vector<4x256xf32>
    %114 = tpu.matmul %113, %111, %cst_51 {dimension_numbers = #tpu.dot_dimension_numbers<[1], [0], [0], [1], [0, 0, 1, 1], [], []>} : vector<4x4xf32>, vector<4x256xf32>, vector<4x256xf32> -> vector<4x256xf32>
    %115 = arith.addf %102, %114 : vector<4x256xf32>
    %c0_52 = arith.constant 0 : index
    %c0_53 = arith.constant 0 : index
    %116 = vector.load %arg4[%c0_52, %c0_53] : memref<4x1xf32, #tpu.memory_space<vmem>>, vector<4x1xf32>
    %117 = vector.broadcast %116 : vector<4x1xf32> to vector<4x256xf32>
    %118 = arith.addf %115, %117 : vector<4x256xf32>
    %cst_54 = arith.constant 0.000000e+00 : f32
    %119 = vector.broadcast %cst_54 : f32 to vector<4x256xf32>
    %120 = arith.maximumf %118, %119 : vector<4x256xf32>
    %cst_55 = arith.constant 0.000000e+00 : f32
    %121 = vector.broadcast %cst_55 : f32 to vector<4x256xf32>
    %cst_56 = arith.constant 0.000000e+00 : f32
    %122 = vector.broadcast %cst_56 : f32 to vector<4x17xf32>
    %123 = vector.extract_strided_slice %120 {offsets = [0, 0], sizes = [4, 239], strides = [1, 1]} : vector<4x256xf32> to vector<4x239xf32>
    %124 = tpu.concatenate %122, %123 in 1 : vector<4x17xf32>, vector<4x239xf32> -> vector<4x256xf32>
    %c1_i32_57 = arith.constant 1 : i32
    %125 = vector.broadcast %c1_i32_57 : i32 to vector<1x256xi32>
    %126 = arith.cmpi sge, %18, %125 : vector<1x256xi32>
    %cst_58 = arith.constant 0.000000e+00 : f32
    %127 = vector.shape_cast %126 : vector<1x256xi1> to vector<1x256xi1>
    %128 = vector.broadcast %127 : vector<1x256xi1> to vector<4x256xi1>
    %129 = vector.broadcast %cst_58 : f32 to vector<4x256xf32>
    %130 = arith.select %128, %124, %129 : vector<4x256xi1>, vector<4x256xf32>
    %c0_59 = arith.constant 0 : index
    %c0_60 = arith.constant 0 : index
    %c0_61 = arith.constant 0 : index
    %131 = vector.load %arg5[%c0_59, %c0_60, %c0_61] : memref<9x4x4xf32, #tpu.memory_space<vmem>>, vector<1x4x4xf32>
    %132 = vector.shape_cast %131 : vector<1x4x4xf32> to vector<4x4xf32>
    %cst_62 = arith.constant dense<0.000000e+00> : vector<4x256xf32>
    %133 = tpu.matmul %132, %130, %cst_62 {dimension_numbers = #tpu.dot_dimension_numbers<[1], [0], [0], [1], [0, 0, 1, 1], [], []>} : vector<4x4xf32>, vector<4x256xf32>, vector<4x256xf32> -> vector<4x256xf32>
    %134 = arith.addf %121, %133 : vector<4x256xf32>
    %cst_63 = arith.constant 0.000000e+00 : f32
    %135 = vector.broadcast %cst_63 : f32 to vector<4x16xf32>
    %136 = vector.extract_strided_slice %120 {offsets = [0, 0], sizes = [4, 240], strides = [1, 1]} : vector<4x256xf32> to vector<4x240xf32>
    %137 = tpu.concatenate %135, %136 in 1 : vector<4x16xf32>, vector<4x240xf32> -> vector<4x256xf32>
    %c1_64 = arith.constant 1 : index
    %c0_65 = arith.constant 0 : index
    %c0_66 = arith.constant 0 : index
    %138 = vector.load %arg5[%c1_64, %c0_65, %c0_66] : memref<9x4x4xf32, #tpu.memory_space<vmem>>, vector<1x4x4xf32>
    %139 = vector.shape_cast %138 : vector<1x4x4xf32> to vector<4x4xf32>
    %cst_67 = arith.constant dense<0.000000e+00> : vector<4x256xf32>
    %140 = tpu.matmul %139, %137, %cst_67 {dimension_numbers = #tpu.dot_dimension_numbers<[1], [0], [0], [1], [0, 0, 1, 1], [], []>} : vector<4x4xf32>, vector<4x256xf32>, vector<4x256xf32> -> vector<4x256xf32>
    %141 = arith.addf %134, %140 : vector<4x256xf32>
    %cst_68 = arith.constant 0.000000e+00 : f32
    %142 = vector.broadcast %cst_68 : f32 to vector<4x15xf32>
    %143 = vector.extract_strided_slice %120 {offsets = [0, 0], sizes = [4, 241], strides = [1, 1]} : vector<4x256xf32> to vector<4x241xf32>
    %144 = tpu.concatenate %142, %143 in 1 : vector<4x15xf32>, vector<4x241xf32> -> vector<4x256xf32>
    %c15_i32_69 = arith.constant 15 : i32
    %145 = vector.broadcast %c15_i32_69 : i32 to vector<1x256xi32>
    %146 = arith.cmpi slt, %18, %145 : vector<1x256xi32>
    %cst_70 = arith.constant 0.000000e+00 : f32
    %147 = vector.shape_cast %146 : vector<1x256xi1> to vector<1x256xi1>
    %148 = vector.broadcast %147 : vector<1x256xi1> to vector<4x256xi1>
    %149 = vector.broadcast %cst_70 : f32 to vector<4x256xf32>
    %150 = arith.select %148, %144, %149 : vector<4x256xi1>, vector<4x256xf32>
    %c2_71 = arith.constant 2 : index
    %c0_72 = arith.constant 0 : index
    %c0_73 = arith.constant 0 : index
    %151 = vector.load %arg5[%c2_71, %c0_72, %c0_73] : memref<9x4x4xf32, #tpu.memory_space<vmem>>, vector<1x4x4xf32>
    %152 = vector.shape_cast %151 : vector<1x4x4xf32> to vector<4x4xf32>
    %cst_74 = arith.constant dense<0.000000e+00> : vector<4x256xf32>
    %153 = tpu.matmul %152, %150, %cst_74 {dimension_numbers = #tpu.dot_dimension_numbers<[1], [0], [0], [1], [0, 0, 1, 1], [], []>} : vector<4x4xf32>, vector<4x256xf32>, vector<4x256xf32> -> vector<4x256xf32>
    %154 = arith.addf %141, %153 : vector<4x256xf32>
    %cst_75 = arith.constant 0.000000e+00 : f32
    %155 = vector.broadcast %cst_75 : f32 to vector<4x1xf32>
    %156 = vector.extract_strided_slice %120 {offsets = [0, 0], sizes = [4, 255], strides = [1, 1]} : vector<4x256xf32> to vector<4x255xf32>
    %157 = tpu.concatenate %155, %156 in 1 : vector<4x1xf32>, vector<4x255xf32> -> vector<4x256xf32>
    %c1_i32_76 = arith.constant 1 : i32
    %158 = vector.broadcast %c1_i32_76 : i32 to vector<1x256xi32>
    %159 = arith.cmpi sge, %18, %158 : vector<1x256xi32>
    %cst_77 = arith.constant 0.000000e+00 : f32
    %160 = vector.shape_cast %159 : vector<1x256xi1> to vector<1x256xi1>
    %161 = vector.broadcast %160 : vector<1x256xi1> to vector<4x256xi1>
    %162 = vector.broadcast %cst_77 : f32 to vector<4x256xf32>
    %163 = arith.select %161, %157, %162 : vector<4x256xi1>, vector<4x256xf32>
    %c3_78 = arith.constant 3 : index
    %c0_79 = arith.constant 0 : index
    %c0_80 = arith.constant 0 : index
    %164 = vector.load %arg5[%c3_78, %c0_79, %c0_80] : memref<9x4x4xf32, #tpu.memory_space<vmem>>, vector<1x4x4xf32>
    %165 = vector.shape_cast %164 : vector<1x4x4xf32> to vector<4x4xf32>
    %cst_81 = arith.constant dense<0.000000e+00> : vector<4x256xf32>
    %166 = tpu.matmul %165, %163, %cst_81 {dimension_numbers = #tpu.dot_dimension_numbers<[1], [0], [0], [1], [0, 0, 1, 1], [], []>} : vector<4x4xf32>, vector<4x256xf32>, vector<4x256xf32> -> vector<4x256xf32>
    %167 = arith.addf %154, %166 : vector<4x256xf32>
    %c4_82 = arith.constant 4 : index
    %c0_83 = arith.constant 0 : index
    %c0_84 = arith.constant 0 : index
    %168 = vector.load %arg5[%c4_82, %c0_83, %c0_84] : memref<9x4x4xf32, #tpu.memory_space<vmem>>, vector<1x4x4xf32>
    %169 = vector.shape_cast %168 : vector<1x4x4xf32> to vector<4x4xf32>
    %cst_85 = arith.constant dense<0.000000e+00> : vector<4x256xf32>
    %170 = tpu.matmul %169, %120, %cst_85 {dimension_numbers = #tpu.dot_dimension_numbers<[1], [0], [0], [1], [0, 0, 1, 1], [], []>} : vector<4x4xf32>, vector<4x256xf32>, vector<4x256xf32> -> vector<4x256xf32>
    %171 = arith.addf %167, %170 : vector<4x256xf32>
    %172 = vector.extract_strided_slice %120 {offsets = [0, 1], sizes = [4, 255], strides = [1, 1]} : vector<4x256xf32> to vector<4x255xf32>
    %cst_86 = arith.constant 0.000000e+00 : f32
    %173 = vector.broadcast %cst_86 : f32 to vector<4x1xf32>
    %174 = tpu.concatenate %172, %173 in 1 : vector<4x255xf32>, vector<4x1xf32> -> vector<4x256xf32>
    %c15_i32_87 = arith.constant 15 : i32
    %175 = vector.broadcast %c15_i32_87 : i32 to vector<1x256xi32>
    %176 = arith.cmpi slt, %18, %175 : vector<1x256xi32>
    %cst_88 = arith.constant 0.000000e+00 : f32
    %177 = vector.shape_cast %176 : vector<1x256xi1> to vector<1x256xi1>
    %178 = vector.broadcast %177 : vector<1x256xi1> to vector<4x256xi1>
    %179 = vector.broadcast %cst_88 : f32 to vector<4x256xf32>
    %180 = arith.select %178, %174, %179 : vector<4x256xi1>, vector<4x256xf32>
    %c5_89 = arith.constant 5 : index
    %c0_90 = arith.constant 0 : index
    %c0_91 = arith.constant 0 : index
    %181 = vector.load %arg5[%c5_89, %c0_90, %c0_91] : memref<9x4x4xf32, #tpu.memory_space<vmem>>, vector<1x4x4xf32>
    %182 = vector.shape_cast %181 : vector<1x4x4xf32> to vector<4x4xf32>
    %cst_92 = arith.constant dense<0.000000e+00> : vector<4x256xf32>
    %183 = tpu.matmul %182, %180, %cst_92 {dimension_numbers = #tpu.dot_dimension_numbers<[1], [0], [0], [1], [0, 0, 1, 1], [], []>} : vector<4x4xf32>, vector<4x256xf32>, vector<4x256xf32> -> vector<4x256xf32>
    %184 = arith.addf %171, %183 : vector<4x256xf32>
    %185 = vector.extract_strided_slice %120 {offsets = [0, 15], sizes = [4, 241], strides = [1, 1]} : vector<4x256xf32> to vector<4x241xf32>
    %cst_93 = arith.constant 0.000000e+00 : f32
    %186 = vector.broadcast %cst_93 : f32 to vector<4x15xf32>
    %187 = tpu.concatenate %185, %186 in 1 : vector<4x241xf32>, vector<4x15xf32> -> vector<4x256xf32>
    %c1_i32_94 = arith.constant 1 : i32
    %188 = vector.broadcast %c1_i32_94 : i32 to vector<1x256xi32>
    %189 = arith.cmpi sge, %18, %188 : vector<1x256xi32>
    %cst_95 = arith.constant 0.000000e+00 : f32
    %190 = vector.shape_cast %189 : vector<1x256xi1> to vector<1x256xi1>
    %191 = vector.broadcast %190 : vector<1x256xi1> to vector<4x256xi1>
    %192 = vector.broadcast %cst_95 : f32 to vector<4x256xf32>
    %193 = arith.select %191, %187, %192 : vector<4x256xi1>, vector<4x256xf32>
    %c6_96 = arith.constant 6 : index
    %c0_97 = arith.constant 0 : index
    %c0_98 = arith.constant 0 : index
    %194 = vector.load %arg5[%c6_96, %c0_97, %c0_98] : memref<9x4x4xf32, #tpu.memory_space<vmem>>, vector<1x4x4xf32>
    %195 = vector.shape_cast %194 : vector<1x4x4xf32> to vector<4x4xf32>
    %cst_99 = arith.constant dense<0.000000e+00> : vector<4x256xf32>
    %196 = tpu.matmul %195, %193, %cst_99 {dimension_numbers = #tpu.dot_dimension_numbers<[1], [0], [0], [1], [0, 0, 1, 1], [], []>} : vector<4x4xf32>, vector<4x256xf32>, vector<4x256xf32> -> vector<4x256xf32>
    %197 = arith.addf %184, %196 : vector<4x256xf32>
    %198 = vector.extract_strided_slice %120 {offsets = [0, 16], sizes = [4, 240], strides = [1, 1]} : vector<4x256xf32> to vector<4x240xf32>
    %cst_100 = arith.constant 0.000000e+00 : f32
    %199 = vector.broadcast %cst_100 : f32 to vector<4x16xf32>
    %200 = tpu.concatenate %198, %199 in 1 : vector<4x240xf32>, vector<4x16xf32> -> vector<4x256xf32>
    %c7_101 = arith.constant 7 : index
    %c0_102 = arith.constant 0 : index
    %c0_103 = arith.constant 0 : index
    %201 = vector.load %arg5[%c7_101, %c0_102, %c0_103] : memref<9x4x4xf32, #tpu.memory_space<vmem>>, vector<1x4x4xf32>
    %202 = vector.shape_cast %201 : vector<1x4x4xf32> to vector<4x4xf32>
    %cst_104 = arith.constant dense<0.000000e+00> : vector<4x256xf32>
    %203 = tpu.matmul %202, %200, %cst_104 {dimension_numbers = #tpu.dot_dimension_numbers<[1], [0], [0], [1], [0, 0, 1, 1], [], []>} : vector<4x4xf32>, vector<4x256xf32>, vector<4x256xf32> -> vector<4x256xf32>
    %204 = arith.addf %197, %203 : vector<4x256xf32>
    %205 = vector.extract_strided_slice %120 {offsets = [0, 17], sizes = [4, 239], strides = [1, 1]} : vector<4x256xf32> to vector<4x239xf32>
    %cst_105 = arith.constant 0.000000e+00 : f32
    %206 = vector.broadcast %cst_105 : f32 to vector<4x17xf32>
    %207 = tpu.concatenate %205, %206 in 1 : vector<4x239xf32>, vector<4x17xf32> -> vector<4x256xf32>
    %c15_i32_106 = arith.constant 15 : i32
    %208 = vector.broadcast %c15_i32_106 : i32 to vector<1x256xi32>
    %209 = arith.cmpi slt, %18, %208 : vector<1x256xi32>
    %cst_107 = arith.constant 0.000000e+00 : f32
    %210 = vector.shape_cast %209 : vector<1x256xi1> to vector<1x256xi1>
    %211 = vector.broadcast %210 : vector<1x256xi1> to vector<4x256xi1>
    %212 = vector.broadcast %cst_107 : f32 to vector<4x256xf32>
    %213 = arith.select %211, %207, %212 : vector<4x256xi1>, vector<4x256xf32>
    %c8_108 = arith.constant 8 : index
    %c0_109 = arith.constant 0 : index
    %c0_110 = arith.constant 0 : index
    %214 = vector.load %arg5[%c8_108, %c0_109, %c0_110] : memref<9x4x4xf32, #tpu.memory_space<vmem>>, vector<1x4x4xf32>
    %215 = vector.shape_cast %214 : vector<1x4x4xf32> to vector<4x4xf32>
    %cst_111 = arith.constant dense<0.000000e+00> : vector<4x256xf32>
    %216 = tpu.matmul %215, %213, %cst_111 {dimension_numbers = #tpu.dot_dimension_numbers<[1], [0], [0], [1], [0, 0, 1, 1], [], []>} : vector<4x4xf32>, vector<4x256xf32>, vector<4x256xf32> -> vector<4x256xf32>
    %217 = arith.addf %204, %216 : vector<4x256xf32>
    %c0_112 = arith.constant 0 : index
    %c0_113 = arith.constant 0 : index
    %218 = vector.load %arg6[%c0_112, %c0_113] : memref<4x1xf32, #tpu.memory_space<vmem>>, vector<4x1xf32>
    %219 = vector.broadcast %218 : vector<4x1xf32> to vector<4x256xf32>
    %220 = arith.addf %217, %219 : vector<4x256xf32>
    %c0_114 = arith.constant 0 : index
    %221 = memref.load %arg1[%c0_114] : memref<1xf32, #tpu.memory_space<smem>>
    %222 = vector.broadcast %221 : f32 to vector<4x256xf32>
    %223 = arith.mulf %220, %222 : vector<4x256xf32>
    %224 = arith.addf %223, %1 : vector<4x256xf32>
    %c0_115 = arith.constant 0 : index
    %c0_116 = arith.constant 0 : index
    %c0_117 = arith.constant 0 : index
    %225 = vector.load %arg7[%c0_115, %c0_116, %c0_117] : memref<1x4x256xf32, #tpu.memory_space<vmem>>, vector<1x4x256xf32>
    %226 = vector.shape_cast %225 : vector<1x4x256xf32> to vector<4x256xf32>
    %227 = vector.shape_cast %224 : vector<4x256xf32> to vector<1x4x256xf32>
    tpu.vector_store %arg7[%c0_115, %c0_116, %c0_117], %227 {strides = array<i32>} : memref<1x4x256xf32, #tpu.memory_space<vmem>>, vector<1x4x256xf32>,
    return
  }
  func.func @transform_0(%arg0: i32) -> i32 {
    %c0_i32 = arith.constant 0 : i32
    %c0_i32_0 = arith.constant 0 : i32
    return %c0_i32 : i32
  }
  func.func @transform_1(%arg0: i32) -> (i32, i32, i32) {
    %c0_i32 = arith.constant 0 : i32
    %c0_i32_0 = arith.constant 0 : i32
    %c0_i32_1 = arith.constant 0 : i32
    return %arg0, %c0_i32, %c0_i32_0 : i32, i32, i32
  }
  func.func @transform_2(%arg0: i32) -> (i32, i32, i32) {
    %c0_i32 = arith.constant 0 : i32
    %c0_i32_0 = arith.constant 0 : i32
    %c0_i32_1 = arith.constant 0 : i32
    %c0_i32_2 = arith.constant 0 : i32
    return %c0_i32, %c0_i32_0, %c0_i32_1 : i32, i32, i32
  }
  func.func @transform_3(%arg0: i32) -> (i32, i32) {
    %c0_i32 = arith.constant 0 : i32
    %c0_i32_0 = arith.constant 0 : i32
    %c0_i32_1 = arith.constant 0 : i32
    return %c0_i32, %c0_i32_0 : i32, i32
  }
  func.func @transform_4(%arg0: i32) -> (i32, i32, i32) {
    %c0_i32 = arith.constant 0 : i32
    %c0_i32_0 = arith.constant 0 : i32
    %c0_i32_1 = arith.constant 0 : i32
    %c0_i32_2 = arith.constant 0 : i32
    return %c0_i32, %c0_i32_0, %c0_i32_1 : i32, i32, i32
  }
  func.func @transform_5(%arg0: i32) -> (i32, i32) {
    %c0_i32 = arith.constant 0 : i32
    %c0_i32_0 = arith.constant 0 : i32
    %c0_i32_1 = arith.constant 0 : i32
    return %c0_i32, %c0_i32_0 : i32, i32
  }
  func.func @transform_6(%arg0: i32) -> (i32, i32, i32) {
    %c0_i32 = arith.constant 0 : i32
    %c0_i32_0 = arith.constant 0 : i32
    %c0_i32_1 = arith.constant 0 : i32
    return %arg0, %c0_i32, %c0_i32_0 : i32, i32, i32
  }
}

</mosaic_0001>

<bundles_post_ra>
// kernel: tpu_custom_call.1
= control target key start
LH: loop header
LB: loop body
LE: loop exit
PB: predicated region body
PF: predicated region fallthrough
CT: control target
= control target key end

     0   :  { %s2681_s0 = inlined_call_operand.<no memory space> [shape: f32[1], index: 0, kind: input, shape index: {}]   ;;  %s2682_s1 = inlined_call_operand.vmem [shape: f32[2,4,256], index: 1, kind: input, shape index: {}]   ;;  %s2683_s2 = inlined_call_operand.vmem [shape: f32[9,4,4], index: 2, kind: input, shape index: {}]   ;;  %s2684_s3 = inlined_call_operand.vmem [shape: f32[4,1], index: 3, kind: input, shape index: {}]   ;;  %s2685_s4 = inlined_call_operand.vmem [shape: f32[9,4,4], index: 4, kind: input, shape index: {}]   ;;  %s2686_s5 = inlined_call_operand.vmem [shape: f32[4,1], index: 5, kind: input, shape index: {}]   ;;  %s2687_s6 = inlined_call_operand.hbm [shape: f32[2,4,256], index: 6, kind: output, shape index: {}]  }
   0x1   :  { %11 = sst [smem:[#allocation2]] %s2681_s0 }
   0x2   :  { %12 = vsyncpa [#allocation4], 0 }
   0x3   :  { %14 = vsyncpa [#allocation4 + $0x1], 0  ;;  %s2297_s23 = smov 0   ;;  %s2299_s24 = smov 0  }
   0x4   :  { %s2301_s25 = smov 0   ;;  %s2303_s26 = smov 0  }
   0x5 LB: > { %s2318_s0 = sadd.s32 4294967295, %s2246_s26   ;;  %s2051_s27 = sadd.s32 4294967294, %s2246_s26   ;;  %s2246_s26 = sphi %s2303_s26, %s2701_s26   ;;  %s2242_s25 = sphi %s2301_s25, %s2700_s25   ;;  %s2238_s24 = sphi %s2299_s24, %s2699_s24   ;;  %s2234_s23 = sphi %s2297_s23, %s2698_s23  }
   0x6   : > { %s2322_s28 = sadd.s32 1, %s2246_s26   ;;  %s158_s29 = sadd.s32 1, %s2242_s25 }
   0x7   : > { %s155_s30 = ssub.s32 %s2246_s26, %s2322_s28  ;;  %p168_p0 = scmp.ne.s32.totalorder %s2242_s25, %s2238_s24 }
   0x8   : > { %p156_p1 = scmp.eq.s32.totalorder %s155_s30, 0  ;;  %p169_p2 = scmp.eq.s32.totalorder %s2318_s0, 1 }
   0x9   : > { %p174_p3 = scmp.ne.s32.totalorder %s2238_s24, %s2234_s23  ;;  %p175_p4 = scmp.eq.s32.totalorder %s2051_s27, 1 }
   0xa   : > { %s2333_s7 = scalar_select %p156_p1, %s2242_s25, %s158_s29  }
   0xb   : > { %p2335_p5 = por %p169_p2, %p168_p0  ;;  %p2339_p6 = por %p175_p4, %p174_p3 }
   0xc   : > { %p2054_p7 = scmp.ge.s32.totalorder %s2246_s26, 1  ;;  %p216_p8 = scmp.lt.s32.totalorder %s2246_s26, 3 }
   0xe   : > { %p217_p9 = pnand %p2054_p7, %p216_p8 }
   0xf   : > { %p246_p10 = scmp.lt.s32.totalorder (!%p217_p9), %s2318_s0, 1  ;;  %s2249_s15 = smov (!%p217_p9), 17  }
  0x10   : > { %220 = sbr.rel (%p217_p9) target bundleno = 740 (0x2e4), region = 44  ;;  %s2250_s16 = smov (!%p217_p9), 16  }
  0x11   : > { %s2251_s17 = smov (!%p217_p9), 15   ;;  %s2252_s18 = smov (!%p217_p9), 1  }
  0x12   : > { %s2253_s19 = smov (!%p217_p9), 127   ;;  %s2254_s20 = smov (!%p217_p9), 113  }
  0x13   : > { %s2256_s21 = smov (!%p217_p9), 112   ;;  %s2257_s22 = smov (!%p217_p9), 111  }
  0x15   : > { %s247_s10 = scalar_select %p246_p10, %s2318_s0, 1  ;;  %v2248_v0 = vmov 0.0   ;;  %v2255_v3 = vmov 0   ;;  %v1124_v4 = vld [vmem:[%s2684_s3] sm:$0xf]  ;;  %v252_v5 = vlaneseq  ;;  %vm285_vm0 = vcmask 138240  }
  0x16   : > { %383 = vmatprep.mubr.f32.mxu0 %v2248_v0  ;;  %463 = vmatprep.mubr.f32.mxu1 %v2248_v0  ;;  %vm313_vm2 = vcmask 1043456   ;;  %vm474_vm4 = vcmask 121856   ;;  %v298_v19 = vld [vmem:[%s2683_s2] sm:$0xf]  ;;  %vm303_vm6 = vcmask 130048   ;;  %vm309_vm7 = vcmask 31744  }
  0x17   : > { %s2133_s11 = sshll.u32 %s247_s10, 3  ;;  %2184 = vset.pattern.permute.xlu0 %v2255_v3  ;;  %v253_v6 = vand.u32 127, %v252_v5  ;;  %v2058_v28 = vld [vmem:[%s2683_s2 + $0x4] sm:$0xf]  ;;  %vm575_vm9 = vcmask 7168   ;;  %vm752_vm10 = vcmask 1039360  }
  0x18   : > { %s250_s14 = scalar_lea.vmem %s2682_s1, %s2133_s11  ;;  %v2065_v36 = vld [vmem:[%s2683_s2 + $0x8] sm:$0xf]  ;;  %v2069_v39 = vld [vmem:[%s2683_s2 + $0xc] sm:$0xf]  ;;  %v2073_v44 = vld [vmem:[%s2683_s2 + $0x10] sm:$0xf] }
  0x19   : > { %v2352_v1 = vld [vmem:[%s250_s14] sm:$0xff]  ;;  %v254_v7 = vadd.s32 128, %v253_v6  ;;  %v259_v11 = vand.u32 15, %v253_v6  ;;  %vm847_vm11 = vcmask 924672   ;;  %v2077_v47 = vld [vmem:[%s2683_s2 + $0x14] sm:$0xf] }
  0x1a   : > { %281 = vrot.lane.b32.xlu1 %v2352_v1, %s2249_s15  ;;  %299 = vrot.lane.b32.xlu0 %v2352_v1, %s2250_s16  ;;  %v2360_v2 = vcombine.high %v2352_v1, %v2352_v1  ;;  %vm942_vm12 = vcmask 916480   ;;  %v2081_v54 = vld [vmem:[%s2683_s2 + $0x18] sm:$0xf]  ;;  %v2085_v59 = vld [vmem:[%s2683_s2 + $0x1c] sm:$0xf]  ;;  %vm1033_vm13 = vcmask 908288  }
  0x1b   : > { %v266_v8 = vand.u32 15, %v254_v7  ;;  %vm2398_vm3 = vcmp.ge.s32.totalorder %v259_v11, 1  ;;  %vm2416_vm8 = vcmp.lt.s32.totalorder %v259_v11, 15  ;;  %v2089_v5 = vld [vmem:[%s2683_s2 + $0x20] sm:$0xf] }
  0x1c   : > { %v2108_v12 = vld [vmem:[%s2685_s4 + $0x10] sm:$0xf]  ;;  %v2116_v21 = vld [vmem:[%s2685_s4 + $0x18] sm:$0xf] }
  0x1d   : > { %vm2393_vm1 = vcmp.ge.s32.totalorder %v266_v8, 1  ;;  %vm2411_vm5 = vcmp.lt.s32.totalorder %v266_v8, 15 }
  0x1e   : > { %470 = vrot.lane.b32.xlu0 %v2352_v1, %s2251_s17  ;;  %283 = vrot.lane.b32.xlu1 %v2360_v2, %s2249_s15 }
  0x22   : > { %472 = vrot.lane.b32.xlu1 %v2360_v2, %s2251_s17  ;;  %301 = vrot.lane.b32.xlu0 %v2360_v2, %s2250_s16 }
  0x26   : > { %573 = vrot.lane.b32.xlu1 %v2360_v2, %s2252_s18  ;;  %571 = vrot.lane.b32.xlu0 %v2352_v1, %s2252_s18 }
  0x2a   : > { %748 = vrot.lane.b32.xlu1 %v2352_v1, %s2253_s19  ;;  %750 = vrot.lane.b32.xlu0 %v2360_v2, %s2253_s19 }
  0x2e   : > { %843 = vrot.lane.b32.xlu1 %v2352_v1, %s2254_s20  ;;  %845 = vrot.lane.b32.xlu0 %v2360_v2, %s2254_s20 }
  0x32   : > { %938 = vrot.lane.b32.xlu1 %v2352_v1, %s2256_s21  ;;  %940 = vrot.lane.b32.xlu0 %v2360_v2, %s2256_s21 }
  0x36   : > { %1029 = vrot.lane.b32.xlu1 %v2352_v1, %s2257_s22  ;;  %1031 = vrot.lane.b32.xlu0 %v2360_v2, %s2257_s22 }
  0x3a   : > { %1127 = vperm.xlu0 %2184, %v1124_v4  }
  0x8c   : > { %v282_v9 = vpop.permute.xlu1 %281  ;;  %v300_v10 = vpop.permute.xlu0 %299 }
  0x8d   : > { %v289_v13 = vsel %vm285_vm0, 0.0, %v282_v9  ;;  %v306_v30 = vsel %vm303_vm6, 0.0, %v300_v10 }
  0x8e   : > { %v296_v20 = vsel %vm2398_vm3, %v289_v13, 0.0 }
  0x90   : > { %v471_v14 = vpop.permute.xlu0 %470  ;;  %v284_v15 = vpop.permute.xlu1 %283 }
  0x91   : > { %v286_v17 = vsel %vm285_vm0, %v282_v9, %v284_v15  ;;  %v478_v25 = vsel %vm474_vm4, 0.0, %v471_v14 }
  0x92   : > { %v297_v18 = vsel %vm2393_vm1, %v286_v17, 0.0  ;;  %v485_v31 = vsel %vm2416_vm8, %v478_v25, 0.0 }
  0x93   : > { %2062 = vmatprep.subr.msk.mxu1 %vm313_vm2, %v297_v18 }
  0x94   : > { %2063 = vmatpush1.msk.msra.mxu1 %vm313_vm2, %v296_v20  ;;  %v473_v22 = vpop.permute.xlu1 %472  ;;  %v302_v23 = vpop.permute.xlu0 %301 }
  0x95   : > { %v475_v26 = vsel %vm474_vm4, %v471_v14, %v473_v22  ;;  %v304_v27 = vsel %vm303_vm6, %v300_v10, %v302_v23  ;;  %2064 = vmatmul.mubr.msk.f32.vlgmr.msra.gmra.mxu1 %vm309_vm7, %v298_v19 }
  0x96   : > { %v486_v29 = vsel %vm2411_vm5, %v475_v26, 0.0  ;;  %2059 = vmatprep.subr.msk.mxu0 %vm313_vm2, %v304_v27  ;;  %657 = vmatprep.mubr.f32.mxu1 %v2248_v0 }
  0x97   : > { %2060 = vmatpush1.msk.msra.mxu0 %vm313_vm2, %v306_v30 }
  0x98   : > { %v574_v32 = vpop.permute.xlu1 %573  ;;  %2066 = vmatprep.subr.msk.mxu0 %vm313_vm2, %v486_v29  ;;  %v572_v33 = vpop.permute.xlu0 %571  ;;  %2061 = vmatmul.mubr.msk.f32.vlgmr.msra.gmra.mxu0 %vm309_vm7, %v2058_v28 }
  0x99   : > { %v576_v34 = vsel %vm575_vm9, %v572_v33, %v574_v32  ;;  %v579_v35 = vsel %vm575_vm9, 0.0, %v572_v33  ;;  %2067 = vmatpush1.msk.msra.mxu0 %vm313_vm2, %v485_v31  ;;  %562 = vmatprep.mubr.f32.mxu0 %v2248_v0 }
  0x9a   : > { %v580_v37 = vsel %vm2398_vm3, %v579_v35, 0.0  ;;  %v581_v38 = vsel %vm2393_vm1, %v576_v34, 0.0  ;;  %2074 = vmatprep.subr.msk.mxu0 %vm313_vm2, %v2360_v2 }
  0x9b   : > { %2070 = vmatprep.subr.msk.mxu1 %vm313_vm2, %v581_v38 }
  0x9c   : > { %v749_v40 = vpop.permute.xlu1 %748  ;;  %2071 = vmatpush1.msk.msra.mxu1 %vm313_vm2, %v580_v37  ;;  %v751_v41 = vpop.permute.xlu0 %750  ;;  %2068 = vmatmul.mubr.msk.f32.vlgmr.msra.gmra.mxu0 %vm309_vm7, %v2065_v36 }
  0x9d   : > { %v753_v42 = vsel %vm752_vm10, %v749_v40, %v751_v41  ;;  %v756_v43 = vsel %vm752_vm10, %v751_v41, 0.0  ;;  %2072 = vmatmul.mubr.msk.f32.vlgmr.msra.gmra.mxu1 %vm309_vm7, %v2069_v39  ;;  %2075 = vmatpush1.msk.msra.mxu0 %vm313_vm2, %v2352_v1 }
  0x9e   : > { %v757_v45 = vsel %vm2416_vm8, %v753_v42, 0.0  ;;  %v758_v46 = vsel %vm2411_vm5, %v756_v43, 0.0  ;;  %739 = vmatprep.mubr.f32.mxu0 %v2248_v0  ;;  %834 = vmatprep.mubr.f32.mxu1 %v2248_v0 }
  0x9f   : > { %2078 = vmatprep.subr.msk.mxu1 %vm313_vm2, %v758_v46 }
  0xa0   : > { %v844_v48 = vpop.permute.xlu1 %843  ;;  %2079 = vmatpush1.msk.msra.mxu1 %vm313_vm2, %v757_v45  ;;  %v846_v49 = vpop.permute.xlu0 %845  ;;  %2076 = vmatmul.mubr.msk.f32.vlgmr.msra.gmra.mxu0 %vm309_vm7, %v2073_v44 }
  0xa1   : > { %v848_v50 = vsel %vm847_vm11, %v844_v48, %v846_v49  ;;  %v851_v51 = vsel %vm847_vm11, %v846_v49, 0.0  ;;  %2080 = vmatmul.mubr.msk.f32.vlgmr.msra.gmra.mxu1 %vm309_vm7, %v2077_v47  ;;  %929 = vmatprep.mubr.f32.mxu0 %v2248_v0  ;;  %v1957_v49 = vld [vmem:[%s2686_s5] sm:$0xf] }
  0xa2   : > { %v852_v52 = vsel %vm2398_vm3, %v848_v50, 0.0  ;;  %v853_v53 = vsel %vm2393_vm1, %v851_v51, 0.0  ;;  %1020 = vmatprep.mubr.f32.mxu1 %v2248_v0 }
  0xa3   : > { %2082 = vmatprep.subr.msk.mxu0 %vm313_vm2, %v853_v53 }
  0xa4   : > { %v939_v55 = vpop.permute.xlu1 %938  ;;  %2083 = vmatpush1.msk.msra.mxu0 %vm313_vm2, %v852_v52  ;;  %v941_v56 = vpop.permute.xlu0 %940 }
  0xa5   : > { %v943_v57 = vsel %vm942_vm12, %v939_v55, %v941_v56  ;;  %v945_v58 = vsel %vm942_vm12, %v941_v56, 0.0  ;;  %2084 = vmatmul.mubr.msk.f32.vlgmr.msra.gmra.mxu0 %vm309_vm7, %v2081_v54 }
  0xa6   : > { %2086 = vmatprep.subr.msk.mxu1 %vm313_vm2, %v945_v58  ;;  %1115 = vmatprep.mubr.f32.mxu0 %v2248_v0 }
  0xa7   : > { %2087 = vmatpush1.msk.msra.mxu1 %vm313_vm2, %v943_v57  ;;  %v2093_v57 = vld [vmem:[%s2685_s4 + $0x4] sm:$0xf] }
  0xa8   : > { %v1030_v60 = vpop.permute.xlu1 %1029  ;;  %2088 = vmatmul.mubr.msk.f32.vlgmr.msra.gmra.mxu1 %vm309_vm7, %v2085_v59  ;;  %v1032_v61 = vpop.permute.xlu0 %1031 }
  0xa9   : > { %v1034_v62 = vsel %vm1033_vm13, %v1030_v60, %v1032_v61  ;;  %v1037_v63 = vsel %vm1033_vm13, %v1032_v61, 0.0  ;;  %1228 = vmatprep.mubr.f32.mxu1 %v2248_v0 }
  0xaa   : > { %v1038_v3 = vsel %vm2416_vm8, %v1034_v62, 0.0  ;;  %v1039_v4 = vsel %vm2411_vm5, %v1037_v63, 0.0 }
  0xab   : > { %2090 = vmatprep.subr.msk.mxu0 %vm313_vm2, %v1039_v4 }
  0xac   : > { %2091 = vmatpush1.msk.msra.mxu0 %vm313_vm2, %v1038_v3  ;;  %v1146_v3 = vld [vmem:[%s2685_s4] sm:$0xf] }
  0xad   : > { %2092 = vmatmul.mubr.msk.f32.vlgmr.msra.gmra.mxu0 %vm309_vm7, %v2089_v5 }
  0xae   : > { %1308 = vmatprep.mubr.f32.mxu0 %v2248_v0 }
  0xb5   : > { %v1128_v38 = vpop.permute.xlu0 %1127 }
 0x155   : > { %v465_v6 = vpop.f32.mrf.mxu1 }
 0x157   : > { %v467_v8 = vpop.f32.mrf.mxu1 }
 0x158   : > { %v385_v7 = vpop.f32.mrf.mxu0 }
 0x159   : > { %v466_v9 = vadd.f32 %v465_v6, %v385_v7 }
 0x15a   : > { %v387_v10 = vpop.f32.mrf.mxu0 }
 0x15b   : > { %v468_v11 = vadd.f32 %v467_v8, %v387_v10  ;;  %v2100_v10 = vld [vmem:[%s2685_s4 + $0x8] sm:$0xf] }
 0x15c   : > { %v564_v13 = vpop.f32.mrf.mxu0 }
 0x15d   : > { %v569_v14 = vadd.f32 %v564_v13, %v466_v9  ;;  %v659_v15 = vpop.f32.mrf.mxu1 }
 0x15e   : > { %v566_v17 = vpop.f32.mrf.mxu0 }
 0x15f   : > { %v570_v18 = vadd.f32 %v566_v17, %v468_v11  ;;  %v664_v19 = vadd.f32 %v659_v15, %v569_v14  ;;  %v661_v20 = vpop.f32.mrf.mxu1 }
 0x160   : > { %v741_v22 = vpop.f32.mrf.mxu0 }
 0x161   : > { %v665_v23 = vadd.f32 %v661_v20, %v570_v18  ;;  %v746_v25 = vadd.f32 %v741_v22, %v664_v19  ;;  %v836_v26 = vpop.f32.mrf.mxu1 }
 0x162   : > { %v743_v27 = vpop.f32.mrf.mxu0 }
 0x163   : > { %v747_v28 = vadd.f32 %v743_v27, %v665_v23  ;;  %v841_v29 = vadd.f32 %v836_v26, %v746_v25  ;;  %v838_v30 = vpop.f32.mrf.mxu1  ;;  %v2104_v25 = vld [vmem:[%s2685_s4 + $0xc] sm:$0xf] }
 0x165   : > { %v931_v31 = vpop.f32.mrf.mxu0  ;;  %v842_v32 = vadd.f32 %v838_v30, %v747_v28 }
 0x166   : > { %v936_v33 = vadd.f32 %v931_v31, %v841_v29 }
 0x167   : > { %v933_v34 = vpop.f32.mrf.mxu0 }
 0x168   : > { %v1022_v35 = vpop.f32.mrf.mxu1  ;;  %v937_v36 = vadd.f32 %v933_v34, %v842_v32 }
 0x169   : > { %v1027_v37 = vadd.f32 %v1022_v35, %v936_v33 }
 0x16a   : > { %v1024_v39 = vpop.f32.mrf.mxu1 }
 0x16b   : > { %v1028_v43 = vadd.f32 %v1024_v39, %v937_v36  ;;  %v2112_v36 = vld [vmem:[%s2685_s4 + $0x14] sm:$0xf] }
 0x16d   : > { %v1117_v40 = vpop.f32.mrf.mxu0 }
 0x16e   : > { %v1122_v41 = vadd.f32 %v1117_v40, %v1027_v37 }
 0x16f   : > { %v1119_v42 = vpop.f32.mrf.mxu0 }
 0x170   : > { %v1130_v44 = vadd.f32 %v1128_v38, %v1122_v41  ;;  %v1123_v45 = vadd.f32 %v1119_v42, %v1028_v43  ;;  %v2124_v41 = vld [vmem:[%s2685_s4 + $0x20] sm:$0xf] }
 0x172   : > { %v2514_v46 = vmax.f32 %v1130_v44, 0.0  ;;  %v1131_v47 = vadd.f32 %v1128_v38, %v1123_v45  ;;  %v2120_v38 = vld [vmem:[%s2685_s4 + $0x1c] sm:$0xf] }
 0x174   : > { %1136 = vrot.lane.b32.xlu0 %v2514_v46, %s2249_s15  ;;  %1147 = vrot.lane.b32.xlu1 %v2514_v46, %s2250_s16  ;;  %v1133_v48 = vmax.f32 %v1131_v47, 0.0 }
 0x178   : > { %1315 = vrot.lane.b32.xlu0 %v2514_v46, %s2251_s17  ;;  %1585 = vrot.lane.b32.xlu1 %v2514_v46, %s2253_s19 }
 0x17c   : > { %1409 = vrot.lane.b32.xlu0 %v2514_v46, %s2252_s18  ;;  %1149 = vrot.lane.b32.xlu1 %v1133_v48, %s2250_s16 }
 0x180   : > { %1587 = vrot.lane.b32.xlu0 %v1133_v48, %s2253_s19  ;;  %1138 = vrot.lane.b32.xlu1 %v1133_v48, %s2249_s15 }
 0x184   : > { %1681 = vrot.lane.b32.xlu0 %v1133_v48, %s2254_s20  ;;  %1317 = vrot.lane.b32.xlu1 %v1133_v48, %s2251_s17  ;;  %s1965_s17 = sld [smem:[#allocation2]] }
 0x188   : > { %1775 = vrot.lane.b32.xlu0 %v1133_v48, %s2256_s21  ;;  %1411 = vrot.lane.b32.xlu1 %v1133_v48, %s2252_s18  ;;  %s243_s18 = sand.u32 1, %s2238_s24  }
 0x189   : > { %s2055_s19 = sshll.u32 %s243_s18, 3  ;;  %s1978_s29 = scalar_lea.sflag [#allocation4], %s243_s18 }
 0x18c   : > { %1865 = vrot.lane.b32.xlu0 %v1133_v48, %s2257_s22  ;;  %1679 = vrot.lane.b32.xlu1 %v2514_v46, %s2254_s20  ;;  %s2134_s20 = sshll.u32 %s2318_s0, 7  ;;  %s2258_s0 = smov [#allocation3]  }
 0x18d   : > { %s1990_s27 = scalar_lea.hbm %s2687_s6, %s2134_s20  ;;  %s2190_s10 = sshll.u32 %s2258_s0, 4  ;;  %s2191_s10 = int_to_ptr.vmem [resolvable:$false] %s2190_s10 }
 0x18e   : > { %s2192_s11 = scalar_lea.vmem %s2191_s10, 256 }
 0x190   : > { %1960 = vperm.xlu0 %2184, %v1957_v49   ;;  %1773 = vrot.lane.b32.xlu1 %v2514_v46, %s2256_s21  ;;  %s245_s21 = scalar_lea.vmem [#allocation3], %s2055_s19 }
 0x194   : > { %1863 = vrot.lane.b32.xlu1 %v2514_v46, %s2257_s22  ;;  %s1992_s22 = sshll.u32 %s245_s21, 4  ;;  %s1993_s22 = int_to_ptr.vmem [resolvable:$true] %s1992_s22 }
 0x195   : > { %s2186_s30 = scalar_lea.vmem %s1993_s22, 128  ;;  %p2193_p0 = scmp.lt.s32.totalorder %s1993_s22, %s2191_s10 }
 0x196   : > { %p2187_p11 = scmp.ne.s32.totalorder %s1993_s22, %s2186_s30  ;;  %p2194_p1 = scmp.lt.s32.totalorder %s2192_s11, %s2186_s30 }
 0x198   : > { %p2188_p12 = pnand %p2187_p11, %p2335_p5  ;;  %p2195_p2 = por %p2194_p1, %p2193_p0 }
 0x19a   : > { %p2189_p13 = pneg %p2188_p12 }
 0x19c   : > { %p2196_p3 = pnand %p2195_p2, %p2189_p13 }
 0x1e6   : > { %v1137_v50 = vpop.permute.xlu0 %1136  ;;  %v1148_v51 = vpop.permute.xlu1 %1147 }
 0x1e7   : > { %v1153_v58 = vsel %vm303_vm6, 0.0, %v1148_v51  ;;  %v1143_v59 = vsel %vm285_vm0, 0.0, %v1137_v50 }
 0x1e8   : > { %v1144_v4 = vsel %vm2398_vm3, %v1143_v59, 0.0 }
 0x1ea   : > { %v1316_v52 = vpop.permute.xlu0 %1315  ;;  %v1586_v53 = vpop.permute.xlu1 %1585 }
 0x1eb   : > { %v1322_v5 = vsel %vm474_vm4, 0.0, %v1316_v52 }
 0x1ec   : > { %v1323_v11 = vsel %vm2416_vm8, %v1322_v5, 0.0 }
 0x1ee   : > { %v1410_v54 = vpop.permute.xlu0 %1409  ;;  %v1150_v55 = vpop.permute.xlu1 %1149 }
 0x1ef   : > { %v1151_v56 = vsel %vm303_vm6, %v1148_v51, %v1150_v55  ;;  %v1416_v14 = vsel %vm575_vm9, 0.0, %v1410_v54 }
 0x1f0   : > { %2094 = vmatprep.subr.msk.mxu1 %vm313_vm2, %v1151_v56  ;;  %v1417_v26 = vsel %vm2398_vm3, %v1416_v14, 0.0  ;;  %v1966_v14 = vstv %s1965_s17 }
 0x1f1   : > { %2095 = vmatpush1.msk.msra.mxu1 %vm313_vm2, %v1153_v58 }
 0x1f2   : > { %v1588_v60 = vpop.permute.xlu0 %1587  ;;  %v1139_v61 = vpop.permute.xlu1 %1138  ;;  %2096 = vmatmul.mubr.msk.f32.vlgmr.msra.gmra.mxu1 %vm309_vm7, %v2093_v57 }
 0x1f3   : > { %v1140_v62 = vsel %vm285_vm0, %v1137_v50, %v1139_v61  ;;  %1400 = vmatprep.mubr.f32.mxu1 %v2248_v0  ;;  %v1592_v18 = vsel %vm752_vm10, %v1588_v60, 0.0  ;;  %v1589_v20 = vsel %vm752_vm10, %v1586_v53, %v1588_v60 }
 0x1f4   : > { %v1145_v63 = vsel %vm2393_vm1, %v1140_v62, 0.0  ;;  %v1594_v27 = vsel %vm2411_vm5, %v1592_v18, 0.0  ;;  %v1593_v30 = vsel %vm2416_vm8, %v1589_v20, 0.0 }
 0x1f5   : > { %2097 = vmatprep.subr.msk.mxu0 %vm313_vm2, %v1145_v63 }
 0x1f6   : > { %v1682_v6 = vpop.permute.xlu0 %1681  ;;  %2098 = vmatpush1.msk.msra.mxu0 %vm313_vm2, %v1144_v4  ;;  %v1318_v7 = vpop.permute.xlu1 %1317 }
 0x1f7   : > { %v1319_v8 = vsel %vm474_vm4, %v1316_v52, %v1318_v7  ;;  %2099 = vmatmul.mubr.msk.f32.vlgmr.msra.gmra.mxu0 %vm309_vm7, %v1146_v3  ;;  %v1686_v13 = vsel %vm847_vm11, %v1682_v6, 0.0 }
 0x1f8   : > { %v1324_v9 = vsel %vm2411_vm5, %v1319_v8, 0.0  ;;  %1494 = vmatprep.mubr.f32.mxu0 %v2248_v0  ;;  %v1688_v22 = vsel %vm2393_vm1, %v1686_v13, 0.0 }
 0x1f9   : > { %2101 = vmatprep.subr.msk.mxu1 %vm313_vm2, %v1324_v9 }
 0x1fa   : > { %v1776_v15 = vpop.permute.xlu0 %1775  ;;  %2102 = vmatpush1.msk.msra.mxu1 %vm313_vm2, %v1323_v11  ;;  %v1412_v17 = vpop.permute.xlu1 %1411 }
 0x1fb   : > { %v1413_v19 = vsel %vm575_vm9, %v1410_v54, %v1412_v17  ;;  %2109 = vmatprep.subr.msk.mxu1 %vm313_vm2, %v1133_v48  ;;  %2103 = vmatmul.mubr.msk.f32.vlgmr.msra.gmra.mxu1 %vm309_vm7, %v2100_v10  ;;  %v1779_v33 = vsel %vm942_vm12, %v1776_v15, 0.0 }
 0x1fc   : > { %v1418_v23 = vsel %vm2393_vm1, %v1413_v19, 0.0  ;;  %2110 = vmatpush1.msk.msra.mxu1 %vm313_vm2, %v2514_v46  ;;  %1576 = vmatprep.mubr.f32.mxu1 %v2248_v0 }
 0x1fd   : > { %2105 = vmatprep.subr.msk.mxu0 %vm313_vm2, %v1418_v23  ;;  %2117 = vmatprep.subr.msk.mxu1 %vm313_vm2, %v1688_v22 }
 0x1fe   : > { %v1866_v28 = vpop.permute.xlu0 %1865  ;;  %2106 = vmatpush1.msk.msra.mxu0 %vm313_vm2, %v1417_v26  ;;  %v1680_v29 = vpop.permute.xlu1 %1679 }
 0x1ff   : > { %v1870_v31 = vsel %vm1033_vm13, %v1866_v28, 0.0  ;;  %v1683_v32 = vsel %vm847_vm11, %v1680_v29, %v1682_v6  ;;  %2107 = vmatmul.mubr.msk.f32.vlgmr.msra.gmra.mxu0 %vm309_vm7, %v2104_v25  ;;  %2113 = vmatprep.subr.msk.mxu0 %vm313_vm2, %v1594_v27 }
 0x200   : > { %v1872_v34 = vsel %vm2411_vm5, %v1870_v31, 0.0  ;;  %v1687_v35 = vsel %vm2398_vm3, %v1683_v32, 0.0  ;;  %2114 = vmatpush1.msk.msra.mxu0 %vm313_vm2, %v1593_v30  ;;  %2111 = vmatmul.mubr.msk.f32.vlgmr.msra.gmra.mxu1 %vm309_vm7, %v2108_v12 }
 0x201   : > { %2118 = vmatpush1.msk.msra.mxu1 %vm313_vm2, %v1687_v35  ;;  %2121 = vmatprep.subr.msk.mxu0 %vm313_vm2, %v1779_v33 }
 0x202   : > { %1670 = vmatprep.mubr.f32.mxu0 %v2248_v0  ;;  %2125 = vmatprep.subr.msk.mxu1 %vm313_vm2, %v1872_v34  ;;  %v1774_v16 = vpop.permute.xlu1 %1773 }
 0x203   : > { %v1777_v37 = vsel %vm942_vm12, %v1774_v16, %v1776_v15  ;;  %2115 = vmatmul.mubr.msk.f32.vlgmr.msra.gmra.mxu0 %vm309_vm7, %v2112_v36  ;;  %1764 = vmatprep.mubr.f32.mxu1 %v2248_v0 }
 0x204   : > { %2122 = vmatpush1.msk.msra.mxu0 %vm313_vm2, %v1777_v37  ;;  %2119 = vmatmul.mubr.msk.f32.vlgmr.msra.gmra.mxu1 %vm309_vm7, %v2116_v21 }
 0x205   : > { %1854 = vmatprep.mubr.f32.mxu0 %v2248_v0  ;;  %1948 = vmatprep.mubr.f32.mxu1 %v2248_v0 }
 0x206   : > { %v1864_v39 = vpop.permute.xlu1 %1863 }
 0x207   : > { %v1867_v40 = vsel %vm1033_vm13, %v1864_v39, %v1866_v28  ;;  %2123 = vmatmul.mubr.msk.f32.vlgmr.msra.gmra.mxu0 %vm309_vm7, %v2120_v38 }
 0x208   : > { %v1871_v42 = vsel %vm2416_vm8, %v1867_v40, 0.0 }
 0x209   : > { %2126 = vmatpush1.msk.msra.mxu1 %vm313_vm2, %v1871_v42 }
 0x20a   : > { %2127 = vmatmul.mubr.msk.f32.vlgmr.msra.gmra.mxu1 %vm309_vm7, %v2124_v41 }
 0x20b   : > { %v1961_v13 = vpop.permute.xlu0 %1960 }
 0x2b2   : > { %v1230_v43 = vpop.f32.mrf.mxu1 }
 0x2b4   : > { %v1232_v44 = vpop.f32.mrf.mxu1 }
 0x2b7   : > { %v1310_v45 = vpop.f32.mrf.mxu0 }
 0x2b8   : > { %v1311_v0 = vadd.f32 %v1310_v45, %v1230_v43 }
 0x2b9   : > { %v1312_v46 = vpop.f32.mrf.mxu0 }
 0x2ba   : > { %v1313_v48 = vadd.f32 %v1312_v46, %v1232_v44 }
 0x2bb   : > { %v1402_v47 = vpop.f32.mrf.mxu1 }
 0x2bc   : > { %v1407_v49 = vadd.f32 %v1402_v47, %v1311_v0 }
 0x2bd   : > { %v1404_v50 = vpop.f32.mrf.mxu1 }
 0x2be   : > { %v1408_v52 = vadd.f32 %v1404_v50, %v1313_v48 }
 0x2bf   : > { %v1496_v51 = vpop.f32.mrf.mxu0 }
 0x2c0   : > { %v1501_v53 = vadd.f32 %v1496_v51, %v1407_v49  ;;  %v1578_v54 = vpop.f32.mrf.mxu1 }
 0x2c1   : > { %v1498_v55 = vpop.f32.mrf.mxu0 }
 0x2c2   : > { %v1502_v24 = vadd.f32 %v1498_v55, %v1408_v52  ;;  %v1583_v56 = vadd.f32 %v1578_v54, %v1501_v53  ;;  %v1580_v57 = vpop.f32.mrf.mxu1 }
 0x2c3   : > { %v1672_v58 = vpop.f32.mrf.mxu0 }
 0x2c4   : > { %v1584_v59 = vadd.f32 %v1580_v57, %v1502_v24  ;;  %v1677_v60 = vadd.f32 %v1672_v58, %v1583_v56  ;;  %v1766_v61 = vpop.f32.mrf.mxu1 }
 0x2c5   : > { %v1674_v62 = vpop.f32.mrf.mxu0 }
 0x2c6   : > { %v1678_v63 = vadd.f32 %v1674_v62, %v1584_v59  ;;  %v1771_v3 = vadd.f32 %v1766_v61, %v1677_v60  ;;  %v1768_v4 = vpop.f32.mrf.mxu1 }
 0x2c7   : > { %v1856_v5 = vpop.f32.mrf.mxu0 }
 0x2c8   : > { %v1772_v6 = vadd.f32 %v1768_v4, %v1678_v63  ;;  %v1861_v7 = vadd.f32 %v1856_v5, %v1771_v3 }
 0x2c9   : > { %v1858_v8 = vpop.f32.mrf.mxu0 }
 0x2ca   : > { %v1862_v9 = vadd.f32 %v1858_v8, %v1772_v6  ;;  %v1950_v10 = vpop.f32.mrf.mxu1 }
 0x2cb   : > { %v1955_v11 = vadd.f32 %v1950_v10, %v1861_v7 }
 0x2cc   : > { %v1952_v15 = vpop.f32.mrf.mxu1 }
 0x2cd   : > { %v1963_v17 = vadd.f32 %v1961_v13, %v1955_v11  ;;  %v1956_v18 = vadd.f32 %v1952_v15, %v1862_v9 }
 0x2cf   : > { %v1967_v19 = vmul.f32 %v1966_v14, %v1963_v17  ;;  %v1964_v20 = vadd.f32 %v1961_v13, %v1956_v18 }
 0x2d1   : > { %v1968_v22 = vmul.f32 %v1966_v14, %v1964_v20  ;;  %v1970_v23 = vadd.f32 %v1967_v19, %v2352_v1 }
 0x2d3   : > { %v1971_v25 = vadd.f32 %v1968_v22, %v2360_v2 }
 0x2d5   : > { %v1974_v26 = vcombine.low %v1970_v23, %v1971_v25 }
 0x2d7   : > { %1976 = vst [vmem:[%s245_s21] sm:$0xff] %v1974_v26 }
 0x2d8   : > { %2199 = shalt.err (!%p2196_p3)
}
 0x2d9   : > { %s2200_s12 = scalar_lea.hbm %s1990_s27, 128  ;;  %s2204_s17 = scalar_lea.hbm %s2687_s6, 256 }
 0x2da   : > { %p2201_p4 = scmp.ne.s32.totalorder %s1990_s27, %s2200_s12  ;;  %p2205_p9 = scmp.lt.s32.totalorder %s1990_s27, %s2687_s6 }
 0x2db   : > { %p2206_p10 = scmp.lt.s32.totalorder %s2204_s17, %s2200_s12 }
 0x2dc   : > { %p2202_p7 = pnand %p2201_p4, %p2335_p5 }
 0x2dd   : > { %p2207_p11 = por %p2206_p10, %p2205_p9 }
 0x2de   : > { %p2203_p8 = pneg %p2202_p7 }
 0x2e0   : > { %p2208_p12 = pnand %p2207_p11, %p2203_p8 }
 0x2e2   : > { %2211 = shalt.err (!%p2208_p12)
}
 0x2e3   : > { %2135 = dma.vmem_to_hbm [thread:$0]  (%p2335_p5), %s1993_s22, 128, %s1990_s27, %s1978_s29  }
 0x2e4 PF: > { %p2141_p13 = scmp.ge.s32.totalorder %s2246_s26, 2  ;;  %s2004_s20 = sand.u32 1, %s2234_s23  }
 0x2e5   : > { %s2005_s21 = scalar_lea.sflag [#allocation4], %s2004_s20 }
 0x2e6   : > { %p2138_p0 = pnand %p2141_p13, %p2339_p6 }
 0x2e8   : > { %p2139_p1 = pneg %p2138_p0 }
 0x2ea   : > { %2229 = dma.done.wait (%p2139_p1), %s2005_s21, 128  }
 0x2eb   : > { %2231 = vsyncadd (%p2139_p1), %s2005_s21, 4294967168  ;;  %p17_p2 = scmp.ge.s32.totalorder %s2322_s28, 4   ;;  %s2698_s23 = smov %s2238_s24 }
 0x2ec   : > { %s2699_s24 = smov %s2242_s25  ;;  %s2700_s25 = smov %s2333_s7 }
 0x2ed   : > { %s2701_s26 = smov %s2322_s28  ;;  %19 = sbr.rel (!%p17_p2) target bundleno = 5 (0x5), region = 95 }
 0x2f2   :  { %2010 = vsyncpa [#allocation4], 1 }
 0x2f3   :  { %2012 = vsyncpa [#allocation4 + $0x1], 1 }

</bundles_post_ra>
